<compile_context>
chip_gen: v5e
topology: v5e:2x2
jax: 0.10.0
libtpu: 0.0.40
codegen_flags: <defaults>
</compile_context>

<pallas_src>
import functools

import jax
import jax.numpy as jnp
from jax import lax
from jax.experimental import pallas as pl
from jax.experimental.pallas import tpu as pltpu


# ---------------------------------------------------------------------------
# Fused kernel body
# ---------------------------------------------------------------------------

def _attention_and_out_proj(q, k, v, wo_ref, bo_ref, o_ref, *,
                            heads, dim_head, scale, compute_dtype):
    """q: (Nq, H*Dh) f32, k/v: (Nk, H*Dh) f32. Writes (Nq, Cq) into o_ref.

    Head merge is fused into the output projection:
        out = sum_h softmax(q_h k_h^T) v_h @ Wo[h*Dh:(h+1)*Dh, :]  + bo
    """
    nq = q.shape[0]
    cq = o_ref.shape[-1]

    # Fold the 1/sqrt(dim_head) scale into q once (Nq*inner muls), not into the
    # (Nq, Nk) score matrix per head.
    q = q * scale

    out_acc = jnp.zeros((nq, cq), jnp.float32)

    for h in range(heads):                          # static, fully unrolled (heads is small)
        sl = slice(h * dim_head, (h + 1) * dim_head)
        q_h = q[:, sl].astype(compute_dtype)        # (Nq, Dh)
        k_h = k[:, sl].astype(compute_dtype)        # (Nk, Dh)
        v_h = v[:, sl].astype(compute_dtype)        # (Nk, Dh)

        # Scores: contract on the last dims -> no transpose of k is materialized.
        s = lax.dot_general(q_h, k_h, (((1,), (1,)), ((), ())),
                            preferred_element_type=jnp.float32)     # (Nq, Nk) f32

        # Softmax kept in f32 (EUP exp; v5e has no bf16 VPU/EUP anyway).
        m = jnp.max(s, axis=-1, keepdims=True)
        p = jnp.exp(s - m)
        l = jnp.sum(p, axis=-1, keepdims=True)

        o_h = jnp.dot(p.astype(compute_dtype), v_h,
                      preferred_element_type=jnp.float32)            # (Nq, Dh) f32
        # Normalize the small (Nq, Dh) output instead of the (Nq, Nk) probabilities;
        # approx=True -> EUP vrcp slot (otherwise idle here).
        o_h = o_h * pl.reciprocal(l, approx=True)

        wo_h = wo_ref[sl, :].astype(compute_dtype)                   # (Dh, Cq)
        out_acc = out_acc + jnp.dot(o_h.astype(compute_dtype), wo_h,
                                    preferred_element_type=jnp.float32)

    out_acc = out_acc + bo_ref[...].astype(jnp.float32)
    o_ref[...] = out_acc.astype(o_ref.dtype)


def _self_attn_kernel(x_ref, wqkv_ref, wo_ref, bo_ref, o_ref, *,
                      heads, dim_head, scale, compute_dtype):
    """Self-attention: single fused QKV GEMM  x @ [Wq|Wk|Wv]."""
    inner = heads * dim_head
    x = x_ref[...].astype(compute_dtype)                             # (Nq, Cq)
    wqkv = wqkv_ref[...].astype(compute_dtype)                       # (Cq, 3*inner)
    qkv = jnp.dot(x, wqkv, preferred_element_type=jnp.float32)       # (Nq, 3*inner) f32
    q = qkv[:, :inner]
    k = qkv[:, inner:2 * inner]
    v = qkv[:, 2 * inner:]
    _attention_and_out_proj(q, k, v, wo_ref, bo_ref, o_ref,
                            heads=heads, dim_head=dim_head,
                            scale=scale, compute_dtype=compute_dtype)


def _cross_attn_kernel(x_ref, ctx_ref, wq_ref, wkv_ref, wo_ref, bo_ref, o_ref, *,
                       heads, dim_head, scale, compute_dtype):
    """Cross-attention: Wq on x, fused [Wk|Wv] GEMM on context."""
    inner = heads * dim_head
    q = jnp.dot(x_ref[...].astype(compute_dtype),
                wq_ref[...].astype(compute_dtype),
                preferred_element_type=jnp.float32)                  # (Nq, inner) f32
    kv = jnp.dot(ctx_ref[...].astype(compute_dtype),
                 wkv_ref[...].astype(compute_dtype),
                 preferred_element_type=jnp.float32)                 # (Nk, 2*inner) f32
    k = kv[:, :inner]
    v = kv[:, inner:]
    _attention_and_out_proj(q, k, v, wo_ref, bo_ref, o_ref,
                            heads=heads, dim_head=dim_head,
                            scale=scale, compute_dtype=compute_dtype)


# ---------------------------------------------------------------------------
# Module-level forward (one pallas_call)
# ---------------------------------------------------------------------------

def memory_efficient_cross_attention(x, context, params, *, heads, dim_head,
                                     compute_dtype=jnp.float32):
    """Forward pass of MemoryEfficientCrossAttention.

    x:       (B, Nq, query_dim)
    context: (B, Nk, context_dim) or None (defaults to x, i.e. self-attention)
    params:  (wq, wk, wv, wo, bo) stored as (in_features, out_features) / (1, out)
    compute_dtype: MXU operand dtype; jnp.bfloat16 recommended on v6e/v7x
                   (accumulation and softmax stay in f32 regardless).
    """
    wq, wk, wv, wo, bo = params
    B, Nq, Cq = x.shape
    inner = heads * dim_head
    scale = float(dim_head) ** -0.5
    common = dict(heads=heads, dim_head=dim_head, scale=scale,
                  compute_dtype=compute_dtype)

    def weight_spec(shape):
        # Resident (same block) across the batch grid axis.
        return pl.BlockSpec(shape, lambda b: (0,) * len(shape))

    cp = pltpu.CompilerParams(dimension_semantics=("parallel",))

    if context is None:
        # Self-attention: one fused GEMM x @ [Wq|Wk|Wv].
        wqkv = jnp.concatenate([wq, wk, wv], axis=1)                 # (Cq, 3*inner)
        kernel = functools.partial(_self_attn_kernel, **common)
        return pl.pallas_call(
            kernel,
            out_shape=jax.ShapeDtypeStruct((B, Nq, Cq), x.dtype),
            grid=(B,),
            in_specs=[
                pl.BlockSpec((None, Nq, Cq), lambda b: (b, 0, 0)),   # x (leading dim squeezed)
                weight_spec((Cq, 3 * inner)),
                weight_spec((inner, Cq)),
                weight_spec((1, Cq)),
            ],
            out_specs=pl.BlockSpec((None, Nq, Cq), lambda b: (b, 0, 0)),
            compiler_params=cp,
        )(x, wqkv, wo, bo)

    # Cross-attention: Wq on x, fused [Wk|Wv] on context.
    Nk, Cc = context.shape[1], context.shape[2]
    wkv = jnp.concatenate([wk, wv], axis=1)                          # (Cc, 2*inner)
    kernel = functools.partial(_cross_attn_kernel, **common)
    return pl.pallas_call(
        kernel,
        out_shape=jax.ShapeDtypeStruct((B, Nq, Cq), x.dtype),
        grid=(B,),
        in_specs=[
            pl.BlockSpec((None, Nq, Cq), lambda b: (b, 0, 0)),       # x
            pl.BlockSpec((None, Nk, Cc), lambda b: (b, 0, 0)),       # context
            weight_spec((Cq, inner)),
            weight_spec((Cc, 2 * inner)),
            weight_spec((inner, Cq)),
            weight_spec((1, Cq)),
        ],
        out_specs=pl.BlockSpec((None, Nq, Cq), lambda b: (b, 0, 0)),
        compiler_params=cp,
    )(x, context, wq, wkv, wo, bo)


# ---------------------------------------------------------------------------
# Pure-JAX reference (for correctness check only)
# ---------------------------------------------------------------------------

def _reference(x, context, params, *, heads, dim_head):
    wq, wk, wv, wo, bo = params
    if context is None:
        context = x
    B, Nq, _ = x.shape
    Nk = context.shape[1]
    q = x @ wq
    k = context @ wk
    v = context @ wv

    def split(t, n):
        return t.reshape(B, n, heads, dim_head).transpose(0, 2, 1, 3)

    qh, kh, vh = split(q, Nq), split(k, Nk), split(v, Nk)
    s = jnp.einsum("bhqd,bhkd->bhqk", qh, kh) * (dim_head ** -0.5)
    p = jax.nn.softmax(s, axis=-1)
    o = jnp.einsum("bhqk,bhkd->bhqd", p, vh)
    o = o.transpose(0, 2, 1, 3).reshape(B, Nq, heads * dim_head)
    return o @ wo + bo[0]


# ---------------------------------------------------------------------------
# Main
# ---------------------------------------------------------------------------

if __name__ == "__main__":
    # Module config: query_dim=32, heads=max(1,2)=2, dim_head=max(32,32)=32.
    B, N, query_dim = 2, 16, 32
    heads, dim_head = 2, 32
    inner = heads * dim_head
    Nk_ctx, context_dim = 8, 48     # separate shapes to exercise the cross-attn path

    key = jax.random.PRNGKey(0)
    kx, kc, kq, kk, kv, ko, kb, kk2, kv2 = jax.random.split(key, 9)

    x = jax.random.normal(kx, (B, N, query_dim), jnp.float32)
    ctx = jax.random.normal(kc, (B, Nk_ctx, context_dim), jnp.float32)

    # Deterministic synthetic weights (nn.Linear shapes, stored transposed: (in, out)).
    wq = jax.random.normal(kq, (query_dim, inner), jnp.float32) * 0.05
    wk = jax.random.normal(kk, (query_dim, inner), jnp.float32) * 0.05
    wv = jax.random.normal(kv, (query_dim, inner), jnp.float32) * 0.05
    wo = jax.random.normal(ko, (inner, query_dim), jnp.float32) * 0.05
    bo = jax.random.normal(kb, (1, query_dim), jnp.float32) * 0.01
    params_self = (wq, wk, wv, wo, bo)

    wk_c = jax.random.normal(kk2, (context_dim, inner), jnp.float32) * 0.05
    wv_c = jax.random.normal(kv2, (context_dim, inner), jnp.float32) * 0.05
    params_cross = (wq, wk_c, wv_c, wo, bo)

    # --- self-attention, f32 operands ---
    out = memory_efficient_cross_attention(x, None, params_self,
                                           heads=heads, dim_head=dim_head)
    out = jax.block_until_ready(out)
    ref = _reference(x, None, params_self, heads=heads, dim_head=dim_head)
    assert out.shape == (B, N, query_dim)
    assert jnp.allclose(out, ref, atol=2e-3, rtol=2e-3), "self-attn f32 mismatch"

    # --- cross-attention, f32 operands ---
    out_c = memory_efficient_cross_attention(x, ctx, params_cross,
                                             heads=heads, dim_head=dim_head)
    out_c = jax.block_until_ready(out_c)
    ref_c = _reference(x, ctx, params_cross, heads=heads, dim_head=dim_head)
    assert out_c.shape == (B, N, query_dim)
    assert jnp.allclose(out_c, ref_c, atol=2e-3, rtol=2e-3), "cross-attn f32 mismatch"

    # --- self-attention, bf16 MXU operands / f32 accumulation (v6e/v7x fast path) ---
    out_bf16 = memory_efficient_cross_attention(x, None, params_self,
                                                heads=heads, dim_head=dim_head,
                                                compute_dtype=jnp.bfloat16)
    out_bf16 = jax.block_until_ready(out_bf16)
    assert jnp.allclose(out_bf16, ref, atol=3e-2, rtol=3e-2), "self-attn bf16 mismatch"

    print("KERNEL_OK")
</pallas_src>

<mosaic_0001>
module attributes {stable_mosaic.version = 11 : i64} {
  func.func @_self_attn_kernel(%arg0: i32, %arg1: memref<1x16x32xf32, #tpu.memory_space<vmem>>, %arg2: memref<32x192xf32, #tpu.memory_space<vmem>>, %arg3: memref<64x32xf32, #tpu.memory_space<vmem>>, %arg4: memref<1x32xf32, #tpu.memory_space<vmem>>, %arg5: memref<1x16x32xf32, #tpu.memory_space<vmem>>) attributes {dimension_semantics = [#tpu.dimension_semantics<parallel>], iteration_bounds = array<i64: 2>, scalar_prefetch = 0 : i64, scratch_operands = 0 : i64, tpu.core_type = #tpu.core_type<tc>, window_params = [{transform_indices = @transform_0, window_bounds = array<i64: 1, 16, 32>}, {pipeline_mode = #tpu.pipeline_mode<synchronous>, transform_indices = @transform_1, window_bounds = array<i64: 32, 192>}, {pipeline_mode = #tpu.pipeline_mode<synchronous>, transform_indices = @transform_2, window_bounds = array<i64: 64, 32>}, {pipeline_mode = #tpu.pipeline_mode<synchronous>, transform_indices = @transform_3, window_bounds = array<i64: 1, 32>}, {transform_indices = @transform_4, window_bounds = array<i64: 1, 16, 32>}]} {
    %c0 = arith.constant 0 : index
    %c0_0 = arith.constant 0 : index
    %c0_1 = arith.constant 0 : index
    %0 = vector.load %arg1[%c0, %c0_0, %c0_1] : memref<1x16x32xf32, #tpu.memory_space<vmem>>, vector<1x16x32xf32>
    %1 = vector.shape_cast %0 : vector<1x16x32xf32> to vector<16x32xf32>
    %c0_2 = arith.constant 0 : index
    %c0_3 = arith.constant 0 : index
    %2 = vector.load %arg2[%c0_2, %c0_3] : memref<32x192xf32, #tpu.memory_space<vmem>>, vector<32x192xf32>
    %cst = arith.constant dense<0.000000e+00> : vector<16x192xf32>
    %3 = tpu.matmul %1, %2, %cst {dimension_numbers = #tpu.dot_dimension_numbers<[1], [0], [0], [1], [0, 0, 1, 1], [], []>} : vector<16x32xf32>, vector<32x192xf32>, vector<16x192xf32> -> vector<16x192xf32>
    %4 = vector.extract_strided_slice %3 {offsets = [0, 0], sizes = [16, 64], strides = [1, 1]} : vector<16x192xf32> to vector<16x64xf32>
    %5 = vector.extract_strided_slice %3 {offsets = [0, 64], sizes = [16, 64], strides = [1, 1]} : vector<16x192xf32> to vector<16x64xf32>
    %6 = vector.extract_strided_slice %3 {offsets = [0, 128], sizes = [16, 64], strides = [1, 1]} : vector<16x192xf32> to vector<16x64xf32>
    %cst_4 = arith.constant 0.176776692 : f32
    %7 = vector.broadcast %cst_4 : f32 to vector<16x64xf32>
    %8 = arith.mulf %4, %7 : vector<16x64xf32>
    %cst_5 = arith.constant 0.000000e+00 : f32
    %9 = vector.broadcast %cst_5 : f32 to vector<16x32xf32>
    %10 = vector.extract_strided_slice %8 {offsets = [0, 0], sizes = [16, 32], strides = [1, 1]} : vector<16x64xf32> to vector<16x32xf32>
    %11 = vector.extract_strided_slice %5 {offsets = [0, 0], sizes = [16, 32], strides = [1, 1]} : vector<16x64xf32> to vector<16x32xf32>
    %12 = vector.extract_strided_slice %6 {offsets = [0, 0], sizes = [16, 32], strides = [1, 1]} : vector<16x64xf32> to vector<16x32xf32>
    %cst_6 = arith.constant dense<0.000000e+00> : vector<16x16xf32>
    %13 = tpu.matmul %10, %11, %cst_6 {dimension_numbers = #tpu.dot_dimension_numbers<[1], [1], [0], [0], [0, 0, 1, 0], [], []>} : vector<16x32xf32>, vector<16x32xf32>, vector<16x16xf32> -> vector<16x16xf32>
    %cst_7 = arith.constant dense<0xFF800000> : vector<16xf32>
    %14 = vector.multi_reduction <maximumf>, %13, %cst_7 [1] : vector<16x16xf32> to vector<16xf32>
    %15 = vector.shape_cast %14 : vector<16xf32> to vector<16x1xf32>
    %16 = vector.broadcast %15 : vector<16x1xf32> to vector<16x16xf32>
    %17 = arith.subf %13, %16 : vector<16x16xf32>
    %18 = math.exp %17 : vector<16x16xf32>
    %cst_8 = arith.constant dense<0.000000e+00> : vector<16xf32>
    %19 = vector.multi_reduction <add>, %18, %cst_8 [1] : vector<16x16xf32> to vector<16xf32>
    %20 = vector.shape_cast %19 : vector<16xf32> to vector<16x1xf32>
    %cst_9 = arith.constant dense<0.000000e+00> : vector<16x32xf32>
    %21 = tpu.matmul %18, %12, %cst_9 {dimension_numbers = #tpu.dot_dimension_numbers<[1], [0], [0], [1], [0, 0, 1, 1], [], []>} : vector<16x16xf32>, vector<16x32xf32>, vector<16x32xf32> -> vector<16x32xf32>
    %22 = tpu.reciprocal %20 {approx = true} : vector<16x1xf32> -> vector<16x1xf32>
    %23 = vector.broadcast %22 : vector<16x1xf32> to vector<16x32xf32>
    %24 = arith.mulf %21, %23 : vector<16x32xf32>
    %c0_10 = arith.constant 0 : index
    %c0_11 = arith.constant 0 : index
    %25 = vector.load %arg3[%c0_10, %c0_11] : memref<64x32xf32, #tpu.memory_space<vmem>>, vector<32x32xf32>
    %cst_12 = arith.constant dense<0.000000e+00> : vector<16x32xf32>
    %26 = tpu.matmul %24, %25, %cst_12 {dimension_numbers = #tpu.dot_dimension_numbers<[1], [0], [0], [1], [0, 0, 1, 1], [], []>} : vector<16x32xf32>, vector<32x32xf32>, vector<16x32xf32> -> vector<16x32xf32>
    %27 = arith.addf %9, %26 : vector<16x32xf32>
    %28 = vector.extract_strided_slice %8 {offsets = [0, 32], sizes = [16, 32], strides = [1, 1]} : vector<16x64xf32> to vector<16x32xf32>
    %29 = vector.extract_strided_slice %5 {offsets = [0, 32], sizes = [16, 32], strides = [1, 1]} : vector<16x64xf32> to vector<16x32xf32>
    %30 = vector.extract_strided_slice %6 {offsets = [0, 32], sizes = [16, 32], strides = [1, 1]} : vector<16x64xf32> to vector<16x32xf32>
    %cst_13 = arith.constant dense<0.000000e+00> : vector<16x16xf32>
    %31 = tpu.matmul %28, %29, %cst_13 {dimension_numbers = #tpu.dot_dimension_numbers<[1], [1], [0], [0], [0, 0, 1, 0], [], []>} : vector<16x32xf32>, vector<16x32xf32>, vector<16x16xf32> -> vector<16x16xf32>
    %cst_14 = arith.constant dense<0xFF800000> : vector<16xf32>
    %32 = vector.multi_reduction <maximumf>, %31, %cst_14 [1] : vector<16x16xf32> to vector<16xf32>
    %33 = vector.shape_cast %32 : vector<16xf32> to vector<16x1xf32>
    %34 = vector.broadcast %33 : vector<16x1xf32> to vector<16x16xf32>
    %35 = arith.subf %31, %34 : vector<16x16xf32>
    %36 = math.exp %35 : vector<16x16xf32>
    %cst_15 = arith.constant dense<0.000000e+00> : vector<16xf32>
    %37 = vector.multi_reduction <add>, %36, %cst_15 [1] : vector<16x16xf32> to vector<16xf32>
    %38 = vector.shape_cast %37 : vector<16xf32> to vector<16x1xf32>
    %cst_16 = arith.constant dense<0.000000e+00> : vector<16x32xf32>
    %39 = tpu.matmul %36, %30, %cst_16 {dimension_numbers = #tpu.dot_dimension_numbers<[1], [0], [0], [1], [0, 0, 1, 1], [], []>} : vector<16x16xf32>, vector<16x32xf32>, vector<16x32xf32> -> vector<16x32xf32>
    %40 = tpu.reciprocal %38 {approx = true} : vector<16x1xf32> -> vector<16x1xf32>
    %41 = vector.broadcast %40 : vector<16x1xf32> to vector<16x32xf32>
    %42 = arith.mulf %39, %41 : vector<16x32xf32>
    %c32 = arith.constant 32 : index
    %c0_17 = arith.constant 0 : index
    %43 = vector.load %arg3[%c32, %c0_17] : memref<64x32xf32, #tpu.memory_space<vmem>>, vector<32x32xf32>
    %cst_18 = arith.constant dense<0.000000e+00> : vector<16x32xf32>
    %44 = tpu.matmul %42, %43, %cst_18 {dimension_numbers = #tpu.dot_dimension_numbers<[1], [0], [0], [1], [0, 0, 1, 1], [], []>} : vector<16x32xf32>, vector<32x32xf32>, vector<16x32xf32> -> vector<16x32xf32>
    %45 = arith.addf %27, %44 : vector<16x32xf32>
    %c0_19 = arith.constant 0 : index
    %c0_20 = arith.constant 0 : index
    %46 = vector.load %arg4[%c0_19, %c0_20] : memref<1x32xf32, #tpu.memory_space<vmem>>, vector<1x32xf32>
    %47 = vector.broadcast %46 : vector<1x32xf32> to vector<16x32xf32>
    %48 = arith.addf %45, %47 : vector<16x32xf32>
    %c0_21 = arith.constant 0 : index
    %c0_22 = arith.constant 0 : index
    %c0_23 = arith.constant 0 : index
    %49 = vector.load %arg5[%c0_21, %c0_22, %c0_23] : memref<1x16x32xf32, #tpu.memory_space<vmem>>, vector<1x16x32xf32>
    %50 = vector.shape_cast %49 : vector<1x16x32xf32> to vector<16x32xf32>
    %51 = vector.shape_cast %48 : vector<16x32xf32> to vector<1x16x32xf32>
    tpu.vector_store %arg5[%c0_21, %c0_22, %c0_23], %51 {strides = array<i32>} : memref<1x16x32xf32, #tpu.memory_space<vmem>>, vector<1x16x32xf32>,
    return
  }
  func.func @transform_0(%arg0: i32) -> (i32, i32, i32) {
    %c0_i32 = arith.constant 0 : i32
    %c0_i32_0 = arith.constant 0 : i32
    %c0_i32_1 = arith.constant 0 : i32
    return %arg0, %c0_i32, %c0_i32_0 : i32, i32, i32
  }
  func.func @transform_1(%arg0: i32) -> (i32, i32) {
    %c0_i32 = arith.constant 0 : i32
    %c0_i32_0 = arith.constant 0 : i32
    %c0_i32_1 = arith.constant 0 : i32
    return %c0_i32, %c0_i32_0 : i32, i32
  }
  func.func @transform_2(%arg0: i32) -> (i32, i32) {
    %c0_i32 = arith.constant 0 : i32
    %c0_i32_0 = arith.constant 0 : i32
    %c0_i32_1 = arith.constant 0 : i32
    return %c0_i32, %c0_i32_0 : i32, i32
  }
  func.func @transform_3(%arg0: i32) -> (i32, i32) {
    %c0_i32 = arith.constant 0 : i32
    %c0_i32_0 = arith.constant 0 : i32
    %c0_i32_1 = arith.constant 0 : i32
    return %c0_i32, %c0_i32_0 : i32, i32
  }
  func.func @transform_4(%arg0: i32) -> (i32, i32, i32) {
    %c0_i32 = arith.constant 0 : i32
    %c0_i32_0 = arith.constant 0 : i32
    %c0_i32_1 = arith.constant 0 : i32
    return %arg0, %c0_i32, %c0_i32_0 : i32, i32, i32
  }
}

</mosaic_0001>

<bundles_post_ra>
// kernel: tpu_custom_call.1
= control target key start
LH: loop header
LB: loop body
LE: loop exit
PB: predicated region body
PF: predicated region fallthrough
CT: control target
= control target key end

     0   :  { %9 = vsyncpa [#allocation3], 0  ;;  %s962_s0 = inlined_call_operand.vmem [shape: f32[2,16,32], index: 0, kind: input, shape index: {}]   ;;  %s963_s1 = inlined_call_operand.vmem [shape: f32[32,192], index: 1, kind: input, shape index: {}]   ;;  %s964_s2 = inlined_call_operand.vmem [shape: f32[64,32], index: 2, kind: input, shape index: {}]   ;;  %s965_s3 = inlined_call_operand.vmem [shape: f32[1,32], index: 3, kind: input, shape index: {}]   ;;  %s966_s4 = inlined_call_operand.hbm [shape: f32[2,16,32], index: 4, kind: output, shape index: {}]  }
   0x1   :  { %11 = vsyncpa [#allocation3 + $0x1], 0  ;;  %s796_s15 = smov 0   ;;  %s798_s16 = smov 0  }
   0x2   :  { %s800_s17 = smov 0   ;;  %s802_s18 = smov 0  }
   0x3 LB: > { %s817_s19 = sadd.s32 4294967295, %s764_s18   ;;  %s602_s20 = sadd.s32 4294967294, %s764_s18   ;;  %s764_s18 = sphi %s802_s18, %s972_s18   ;;  %s760_s17 = sphi %s800_s17, %s971_s17   ;;  %s756_s16 = sphi %s798_s16, %s970_s16   ;;  %s752_s15 = sphi %s796_s15, %s969_s15  }
   0x4   : > { %s821_s21 = sadd.s32 1, %s764_s18   ;;  %s113_s22 = sadd.s32 1, %s760_s17 }
   0x5   : > { %s110_s23 = ssub.s32 %s764_s18, %s821_s21  ;;  %p123_p0 = scmp.ne.s32.totalorder %s760_s17, %s756_s16 }
   0x6   : > { %p111_p1 = scmp.eq.s32.totalorder %s110_s23, 0  ;;  %p124_p2 = scmp.eq.s32.totalorder %s817_s19, 1 }
   0x7   : > { %p129_p3 = scmp.ne.s32.totalorder %s756_s16, %s752_s15  ;;  %p130_p4 = scmp.eq.s32.totalorder %s602_s20, 1 }
   0x8   : > { %s832_s24 = scalar_select %p111_p1, %s760_s17, %s113_s22  }
   0x9   : > { %p834_p5 = por %p124_p2, %p123_p0  ;;  %p838_p6 = por %p130_p4, %p129_p3 }
   0xa   : > { %p605_p7 = scmp.ge.s32.totalorder %s764_s18, 1  ;;  %p165_p8 = scmp.lt.s32.totalorder %s764_s18, 3 }
   0xc   : > { %p166_p9 = pnand %p605_p7, %p165_p8 }
   0xd   : > { %p191_p10 = scmp.lt.s32.totalorder (!%p166_p9), %s817_s19, 1  ;;  %s766_s5 = smov (!%p166_p9), 32  }
   0xe   : > { %169 = sbr.rel (%p166_p9) target bundleno = 1097 (0x449), region = 36  ;;  %s767_s6 = smov (!%p166_p9), 64  }
   0xf   : > { %s768_s7 = smov (!%p166_p9), 96   ;;  %s635_s12 = sshll.u32 (!%p166_p9), %s817_s19, 4 }
  0x10   : > { %s536_s20 = scalar_lea.hbm (!%p166_p9), %s966_s4, %s635_s12 }
  0x11   : > { %s539_s23 = sshll.u32 (!%p166_p9), %s536_s20, 4  ;;  %s540_s23 = int_to_ptr.hbm [resolvable:$true] %s539_s23 }
  0x13   : > { %v204_v0 = vld [vmem:[%s963_s1 + $0x30] sm:$0xff]  ;;  %v202_v1 = vld [vmem:[%s963_s1 + $0x20] sm:$0xff]  ;;  %v205_v2 = vld [vmem:[%s963_s1 + $0x38] sm:$0xff]  ;;  %s192_s11 = scalar_select %p191_p10, %s817_s19, 1  ;;  %vm206_vm0 = vcmask 261120   ;;  %vm300_vm1 = vcmask 130048  }
  0x14   : > { %225 = vmatpush.msra.mxu0 %v204_v0  ;;  %v203_v3 = vld [vmem:[%s963_s1 + $0x28] sm:$0xff]  ;;  %v200_v4 = vld [vmem:[%s963_s1 + $0x10] sm:$0xff]  ;;  %248 = vmatpush.msra.mxu1 %v205_v2  ;;  %v201_v5 = vld [vmem:[%s963_s1 + $0x18] sm:$0xff] }
  0x15   : > { %v198_v6 = vld [vmem:[%s963_s1] sm:$0xff]  ;;  %s634_s22 = sshll.u32 %s192_s11, 4  ;;  %v199_v7 = vld [vmem:[%s963_s1 + $0x8] sm:$0xff]  ;;  %v355_v39 = vld [vmem:[%s964_s2 + $0x18] sm:$0xff] }
  0x16   : > { %226 = vmatpush.msra.mxu0 %v202_v1  ;;  %249 = vmatpush.msra.mxu1 %v203_v3  ;;  %s195_s28 = scalar_lea.vmem %s962_s0, %s634_s22  ;;  %v354_v40 = vld [vmem:[%s964_s2 + $0x10] sm:$0xff]  ;;  %v353_v41 = vld [vmem:[%s964_s2 + $0x8] sm:$0xff]  ;;  %v352_v42 = vld [vmem:[%s964_s2] sm:$0xff] }
  0x17   : > { %v196_v8 = vld [vmem:[%s195_s28] sm:$0xff]  ;;  %v197_v9 = vld [vmem:[%s195_s28 + $0x8] sm:$0xff]  ;;  %v457_v52 = vld [vmem:[%s964_s2 + $0x38] sm:$0xff]  ;;  %s716_s28 = sshra.s32 %s540_s23, 4  ;;  %s717_s28 = int_to_ptr.hbm [resolvable:$true] %s716_s28 }
  0x18   : > { %227 = vmatpush.msra.mxu0 %v200_v4  ;;  %250 = vmatpush.msra.mxu1 %v201_v5  ;;  %v456_v0 = vld [vmem:[%s964_s2 + $0x30] sm:$0xff]  ;;  %v455_v1 = vld [vmem:[%s964_s2 + $0x28] sm:$0xff]  ;;  %v454_v2 = vld [vmem:[%s964_s2 + $0x20] sm:$0xff]  ;;  %s718_s29 = scalar_lea.hbm %s717_s28, 16  ;;  %p723_p0 = scmp.lt.s32.totalorder %s717_s28, %s966_s4 }
  0x19   : > { %p719_p11 = scmp.ne.s32.totalorder %s717_s28, %s718_s29 }
  0x1a   : > { %228 = vmatpush.msra.mxu0 %v198_v6  ;;  %251 = vmatpush.msra.mxu1 %v199_v7 }
  0x1b   : > { %609 = vmatmul.msk.f32.vlgmr.msra.gmra.mxu0 %vm206_vm0, %v196_v8  ;;  %611 = vmatmul.msk.f32.vlgmr.msra.gmra.mxu1 %vm206_vm0, %v196_v8  ;;  %p720_p12 = pnand %p719_p11, %p834_p5 }
  0x1c   : > { %476 = vmatpush.msrb.mxu1 %v457_v52 }
  0x1d   : > { %p721_p13 = pneg %p720_p12 }
  0x1e   : > { %477 = vmatpush.msrb.mxu1 %v456_v0 }
  0x20   : > { %478 = vmatpush.msrb.mxu1 %v455_v1 }
  0x22   : > { %479 = vmatpush.msrb.mxu1 %v454_v2 }
  0x23   : > { %610 = vmatmul.msk.f32.gmra.mxu0 %vm206_vm0, %v197_v9  ;;  %612 = vmatmul.msk.f32.gmra.mxu1 %vm206_vm0, %v197_v9 }
  0x98   : > { %v230_v10 = vpop.f32.mrf.mxu0  ;;  %v253_v11 = vpop.f32.mrf.mxu1 }
  0x99   : > { %v259_v14 = vmul.f32 0.17677669, %v230_v10 }
  0xa0   : > { %v233_v12 = vpop.f32.mrf.mxu0  ;;  %v256_v13 = vpop.f32.mrf.mxu1 }
  0xa1   : > { %362 = vrot.lane.b32.xlu2 %v233_v12, %s766_s5  ;;  %265 = vrot.lane.b32.xlu0 %v233_v12, %s767_s6  ;;  %v260_v19 = vmul.f32 0.17677669, %v233_v12  ;;  %v680_v24 = vpack.i.bf16 %v253_v11, %v256_v13 }
  0xa2   : > { %339 = vmatpush.msra.mxu3 %v256_v13 }
  0xa4   : > { %340 = vmatpush.msra.mxu3 %v253_v11 }
  0xa9   : > { %360 = vrot.lane.b32.xlu2 %v230_v10, %s766_s5  ;;  %263 = vrot.lane.b32.xlu0 %v230_v10, %s767_s6  ;;  %s722_s5 = scalar_lea.hbm %s966_s4, 32 }
  0xaa   : > { %p724_p1 = scmp.lt.s32.totalorder %s722_s5, %s718_s29 }
  0xac   : > { %p725_p2 = por %p724_p1, %p723_p0 }
  0xae   : > { %p726_p3 = pnand %p725_p2, %p721_p13 }
  0xb1   : > { %356 = vrot.lane.b32.xlu0 %v259_v14, %s768_s7 }
  0xfb   : > { %v363_v15 = vpop.permute.xlu2 %362 }
  0xfc   : > { %619 = vmatpush.xpose.msk.msrb.mxu3 %vm206_vm0, %v363_v15 }
 0x103   : > { %v361_v16 = vpop.permute.xlu2 %360 }
 0x104   : > { %620 = vmatpush.xpose.msk.msrb.mxu3 %vm206_vm0, %v361_v16 }
 0x113   : > { %v266_v17 = vpop.permute.xlu0 %265 }
 0x114   : > { %613 = vmatpush.xpose.msk.msra.mxu2 %vm206_vm0, %v266_v17 }
 0x11b   : > { %v264_v18 = vpop.permute.xlu0 %263 }
 0x11c   : > { %614 = vmatpush.xpose.msk.msra.mxu2 %vm206_vm0, %v264_v18 }
 0x11f   : > { %615 = vmatmul.msk.f32.vlgmr.msra.gmra.mxu2 %vm206_vm0, %v259_v14  ;;  %v685_v14 = vld [vmem:[%s965_s3] ss:$0 sm:$0xff] }
 0x120   : > { %505 = vmatpush.msrb.mxu2 %v355_v39 }
 0x122   : > { %506 = vmatpush.msrb.mxu2 %v354_v40 }
 0x123   : > { %v357_v34 = vpop.permute.xlu0 %356 }
 0x124   : > { %507 = vmatpush.msrb.mxu2 %v353_v41 }
 0x126   : > { %508 = vmatpush.msrb.mxu2 %v352_v42 }
 0x127   : > { %616 = vmatmul.msk.f32.gmra.mxu2 %vm206_vm0, %v260_v19 }
 0x1a2   : > { %v294_v20 = vpop.f32.mrf.mxu2 }
 0x1a3   : > { %v301_v21 = vsel %vm300_vm1, %v294_v20, -inf }
 0x1a4   : > { %302 = vmax.xlane.f32.xlu1 %v301_v21 }
 0x1aa   : > { %v297_v22 = vpop.f32.mrf.mxu2 }
 0x1ab   : > { %v304_v23 = vsel %vm300_vm1, %v297_v22, -inf }
 0x1ac   : > { %305 = vmax.xlane.f32.xlu1 %v304_v23 }
 0x1c5   : > { %358 = vrot.lane.b32.xlu1 %v260_v19, %s768_s7 }
 0x1cd   : > { %681 = vrot.lane.b32.xlu1 %v680_v24, %s768_s7  ;;  %s188_s7 = sand.u32 1, %s756_s16  }
 0x1ce   : > { %s606_s8 = sshll.u32 %s188_s7, 4  ;;  %s525_s27 = scalar_lea.sflag [#allocation3], %s188_s7 }
 0x1cf   : > { %s190_s11 = scalar_lea.vmem [#allocation2], %s606_s8 }
 0x1d0   : > { %s537_s22 = sshll.u32 %s190_s11, 4  ;;  %s538_s22 = int_to_ptr.vmem [resolvable:$true] %s537_s22 }
 0x217   : > { %v303_v25 = vpop.xlane.xlu1 %302 }
 0x218   : > { %v307_v26 = vsub.f32 %v294_v20, %v303_v25 }
 0x21a   : > { %v309_v27 = vmul.f32 1.442695, %v307_v26 }
 0x21c   : > { %686 = vpow2.f32 %v309_v27 }
 0x21f   : > { %v306_v28 = vpop.xlane.xlu1 %305 }
 0x220   : > { %v308_v29 = vsub.f32 %v297_v22, %v306_v28 }
 0x222   : > { %v687_v30 = vpop.eup %686  ;;  %v311_v31 = vmul.f32 1.442695, %v308_v29 }
 0x223   : > { %617 = vmatmul.msk.f32.vlgmr.msra.gmra.mxu3 %vm300_vm1, %v687_v30  ;;  %v313_v32 = vsel %vm300_vm1, %v687_v30, 0.0 }
 0x224   : > { %688 = vpow2.f32 %v311_v31  ;;  %314 = vadd.xlane.f32.xlu1 %v313_v32 }
 0x22a   : > { %v689_v33 = vpop.eup %688 }
 0x22b   : > { %618 = vmatmul.msk.f32.gmra.mxu3 %vm300_vm1, %v689_v33  ;;  %v316_v62 = vsel %vm300_vm1, %v689_v33, 0.0 }
 0x233   : > { %621 = vmatmul.msk.f32.vlgmr.msrb.gmra.mxu3 %vm206_vm0, %v357_v34 }
 0x237   : > { %v359_v35 = vpop.permute.xlu1 %358 }
 0x23b   : > { %622 = vmatmul.msk.f32.gmra.mxu3 %vm206_vm0, %v359_v35 }
 0x23f   : > { %v682_v36 = vpop.permute.xlu1 %681 }
 0x240   : > { %v683_v37 = vunpack.i.l.bf16 %v682_v36  ;;  %v684_v38 = vunpack.i.h.bf16 %v682_v36 }
 0x242   : > { %441 = vmatpush.msrb.mxu0 %v683_v37 }
 0x244   : > { %442 = vmatpush.msrb.mxu0 %v684_v38 }
 0x297   : > { %v315_v43 = vpop.xlane.xlu1 %314 }
 0x298   : > { %690 = vrcp.f32 %v315_v43 }
 0x29e   : > { %v691_v44 = vpop.eup %690 }
 0x2a6   : > { %v342_v45 = vpop.f32.mrf.mxu3 }
 0x2a7   : > { %v350_v46 = vmul.f32 %v691_v44, %v342_v45 }
 0x2a9   : > { %627 = vmatmul.msk.f32.vlgmr.msrb.gmra.mxu2 %vm206_vm0, %v350_v46 }
 0x2ae   : > { %v345_v47 = vpop.f32.mrf.mxu3 }
 0x2b6   : > { %v389_v48 = vpop.f32.mrf.mxu3 }
 0x2b7   : > { %v395_v49 = vsel %vm300_vm1, %v389_v48, -inf }
 0x2b8   : > { %396 = vmax.xlane.f32.xlu2 %v395_v49 }
 0x2be   : > { %v392_v50 = vpop.f32.mrf.mxu3 }
 0x2bf   : > { %v398_v51 = vsel %vm300_vm1, %v392_v50, -inf }
 0x2c0   : > { %399 = vmax.xlane.f32.xlu0 %v398_v51 }
 0x32b   : > { %v397_v53 = vpop.xlane.xlu2 %396 }
 0x32c   : > { %v401_v54 = vsub.f32 %v389_v48, %v397_v53  ;;  %v510_v15 = vpop.f32.mrf.mxu2 }
 0x32e   : > { %v403_v55 = vmul.f32 1.442695, %v401_v54 }
 0x330   : > { %692 = vpow2.f32 %v403_v55 }
 0x333   : > { %v400_v56 = vpop.xlane.xlu0 %399 }
 0x334   : > { %v402_v57 = vsub.f32 %v392_v50, %v400_v56 }
 0x336   : > { %v693_v58 = vpop.eup %692  ;;  %v405_v59 = vmul.f32 1.442695, %v402_v57 }
 0x337   : > { %623 = vmatmul.msk.f32.vlgmr.msrb.gmra.mxu0 %vm300_vm1, %v693_v58  ;;  %v407_v60 = vsel %vm300_vm1, %v693_v58, 0.0 }
 0x338   : > { %694 = vpow2.f32 %v405_v59  ;;  %408 = vadd.xlane.f32.xlu2 %v407_v60 }
 0x33e   : > { %v695_v61 = vpop.eup %694 }
 0x33f   : > { %624 = vmatmul.msk.f32.gmra.mxu0 %vm300_vm1, %v695_v61  ;;  %v410_v63 = vsel %vm300_vm1, %v695_v61, 0.0 }
 0x340   : > { %317 = vadd.xlane.f32.xlu2 %v316_v62  ;;  %411 = vadd.xlane.f32.xlu0 %v410_v63 }
 0x3ab   : > { %v409_v3 = vpop.xlane.xlu2 %408 }
 0x3ac   : > { %696 = vrcp.f32 %v409_v3 }
 0x3b2   : > { %v697_v6 = vpop.eup %696 }
 0x3b3   : > { %v318_v4 = vpop.xlane.xlu2 %317  ;;  %v412_v5 = vpop.xlane.xlu0 %411 }
 0x3b4   : > { %698 = vrcp.f32 %v318_v4  ;;  %v444_v7 = vpop.f32.mrf.mxu0 }
 0x3b5   : > { %v452_v8 = vmul.f32 %v697_v6, %v444_v7  ;;  %700 = vrcp.f32 %v412_v5 }
 0x3b7   : > { %625 = vmatmul.msk.f32.vlgmr.msrb.gmra.mxu1 %vm206_vm0, %v452_v8 }
 0x3ba   : > { %v699_v9 = vpop.eup %698 }
 0x3bb   : > { %v351_v10 = vmul.f32 %v699_v9, %v345_v47  ;;  %v701_v11 = vpop.eup %700 }
 0x3bc   : > { %v447_v12 = vpop.f32.mrf.mxu0 }
 0x3bd   : > { %v453_v13 = vmul.f32 %v701_v11, %v447_v12  ;;  %628 = vmatmul.msk.f32.gmra.mxu2 %vm206_vm0, %v351_v10 }
 0x3bf   : > { %626 = vmatmul.msk.f32.gmra.mxu1 %vm206_vm0, %v453_v13 }
 0x434   : > { %v481_v16 = vpop.f32.mrf.mxu1 }
 0x435   : > { %v511_v17 = vadd.f32 %v510_v15, %v481_v16 }
 0x437   : > { %v520_v18 = vadd.f32 %v685_v14, %v511_v17 }
 0x439   : > { %522 = vst.msk [vmem:[%s190_s11] sm:$0xff] %vm206_vm0, %v520_v18 }
 0x43c   : > { %v484_v19 = vpop.f32.mrf.mxu1 }
 0x440   : > { %v513_v20 = vpop.f32.mrf.mxu2 }
 0x441   : > { %v514_v21 = vadd.f32 %v513_v20, %v484_v19 }
 0x443   : > { %v521_v22 = vadd.f32 %v685_v14, %v514_v21 }
 0x445   : > { %523 = vst.msk [vmem:[%s190_s11 + $0x8] sm:$0xff] %vm206_vm0, %v521_v22 }
 0x446   : > { %729 = shalt.err (!%p726_p3)
}
 0x447   : > { %s769_s7 = smov 128   ;;  %s770_s9 = smov 8  }
 0x448   : > { %636 = dma.vmem_to_hbm [thread:$0]  (%p834_p5), %s538_s22, 256, %s540_s23, %s525_s27, %s769_s7, %s769_s7, %s770_s9  }
 0x449 PF: > { %p642_p4 = scmp.ge.s32.totalorder %s764_s18, 2  ;;  %s554_s10 = sand.u32 1, %s752_s15  }
 0x44a   : > { %s555_s11 = scalar_lea.sflag [#allocation3], %s554_s10 }
 0x44b   : > { %p639_p7 = pnand %p642_p4, %p838_p6 }
 0x44d   : > { %p640_p8 = pneg %p639_p7 }
 0x44f   : > { %747 = dma.done.wait (%p640_p8), %s555_s11, 256  }
 0x450   : > { %749 = vsyncadd (%p640_p8), %s555_s11, 4294967040  ;;  %p14_p9 = scmp.ge.s32.totalorder %s821_s21, 4   ;;  %s969_s15 = smov %s756_s16 }
 0x451   : > { %s970_s16 = smov %s760_s17  ;;  %s971_s17 = smov %s832_s24 }
 0x452   : > { %s972_s18 = smov %s821_s21  ;;  %16 = sbr.rel (!%p14_p9) target bundleno = 3 (0x3), region = 71 }
 0x457   :  { %561 = vsyncpa [#allocation3], 1 }
 0x458   :  { %563 = vsyncpa [#allocation3 + $0x1], 1 }

</bundles_post_ra>
